<compile_context>
chip_gen: v7x
topology: tpu7x:2x2x1
jax: 0.10.0
libtpu: 0.0.40
codegen_flags: <defaults>
</compile_context>

<pallas_src>
import functools

import jax
import jax.numpy as jnp
from jax.experimental import pallas as pl
from jax.experimental.pallas import tpu as pltpu


def _round_up(x, m):
    return ((x + m - 1) // m) * m


def _block_diag(blocks):
    """Block-diagonal matrix from a list of 2-D arrays (tiny, wrapper-side)."""
    rows = sum(b.shape[0] for b in blocks)
    cols = sum(b.shape[1] for b in blocks)
    out = jnp.zeros((rows, cols), blocks[0].dtype)
    r = c = 0
    for b in blocks:
        out = out.at[r:r + b.shape[0], c:c + b.shape[1]].set(b)
        r += b.shape[0]
        c += b.shape[1]
    return out


# ----------------------------- fused kernel ---------------------------------

def _sign_fused_kernel(*refs, n_layers, cast_bf16):
    """Fully fused SIGN forward for one node tile.

    refs layout (inputs then output):
      [alphas (SMEM, shape (2,)): [sign_prelu_alpha, projection_alpha],
       x_cat (tile_n, num_hops*in_feats),
       inception block-diag W_0..W_{L-1}, b_0..b_{L-1}, alpha_vec_0..alpha_vec_{L-2},
       projection W_0..W_{L-1}, b_0..b_{L-1},
       out (tile_n, out_feats)]
    """
    scal_ref = refs[0]
    x_ref = refs[1]
    out_ref = refs[-1]

    pos = 2
    inc_w = refs[pos:pos + n_layers]; pos += n_layers
    inc_b = refs[pos:pos + n_layers]; pos += n_layers
    inc_a = refs[pos:pos + n_layers - 1]; pos += n_layers - 1
    prj_w = refs[pos:pos + n_layers]; pos += n_layers
    prj_b = refs[pos:pos + n_layers]; pos += n_layers

    def mxu_dot(x, w_ref):
        if cast_bf16:
            x = x.astype(jnp.bfloat16)          # weights were pre-cast in wrapper
        return jnp.dot(x, w_ref[...], preferred_element_type=jnp.float32)

    def prelu(x, a):
        return jnp.where(x >= 0, x, a * x)

    alpha_sign = scal_ref[0]
    alpha_proj = scal_ref[1]

    x = x_ref[...]

    # ---- inception FFNs: ONE block-diagonal matmul per layer ---------------
    # (per-hop PReLU alphas enter as a (1, num_hops*hidden) row vector)
    for l in range(n_layers):
        x = mxu_dot(x, inc_w[l]) + inc_b[l][...]
        if l < n_layers - 1:
            x = prelu(x, inc_a[l][...])         # dropout = identity (eval)

    # ---- SIGN-level PReLU on concat(hidden) (scalar alpha) -----------------
    x = prelu(x, alpha_sign)

    # ---- projection FFN: layer 0 is a single concat-K dot ------------------
    for l in range(n_layers):
        x = mxu_dot(x, prj_w[l]) + prj_b[l][...]
        if l < n_layers - 1:
            x = prelu(x, alpha_proj)

    out_ref[...] = x.astype(out_ref.dtype)


# ------------------------------ wrapper --------------------------------------

def sign_forward(feats, params, *, tile_n=1024, cast_to_bf16=True):
    """Fused SIGN forward.

    feats: list of num_hops arrays [N, in_feats] OR a single pre-concatenated
           [N, num_hops*in_feats] array.  (SIGN hop features are precomputed
           once per dataset, so in production pass the concatenated matrix to
           avoid the per-call concat copy.)
    """
    inception = params["inception"]
    num_hops = len(inception)
    n_layers = len(inception[0]["weights"])
    out_feats = params["project"]["weights"][-1].shape[1]

    if isinstance(feats, (list, tuple)):
        x = jnp.concatenate(list(feats), axis=-1)
    else:
        x = feats
    n, feat_width = x.shape

    wdtype = jnp.bfloat16 if cast_to_bf16 else jnp.float32

    # Hop-batched ("block-diagonal") inception parameters.  Weights pre-cast
    # to bf16 once here; biases / alphas stay f32 (elementwise math in f32).
    inc_w, inc_b, inc_a = [], [], []
    for l in range(n_layers):
        inc_w.append(_block_diag([p["weights"][l] for p in inception]).astype(wdtype))
        inc_b.append(jnp.concatenate([p["biases"][l] for p in inception],
                                     axis=-1).astype(jnp.float32))
        if l < n_layers - 1:
            inc_a.append(jnp.concatenate(
                [jnp.full((1, p["weights"][l].shape[1]), p["alpha"], jnp.float32)
                 for p in inception], axis=-1))
    prj_w = [w.astype(wdtype) for w in params["project"]["weights"]]
    prj_b = [b.astype(jnp.float32) for b in params["project"]["biases"]]
    scal = jnp.stack(
        [params["prelu_alpha"], params["project"]["alpha"]]).astype(jnp.float32)

    const_args = [*inc_w, *inc_b, *inc_a, *prj_w, *prj_b]
    args = [scal, x, *const_args]

    # Node tiling: big row tiles (rows are independent -> "parallel" grid).
    # Keep >= 2 grid steps when possible so v7x's 2 TensorCores both get work.
    # No padding: grid = cdiv(N, tile_n); Pallas masks the ragged last block.
    cap = _round_up(max(8, (n + 1) // 2), 8)
    tile_n = max(8, min(int(tile_n), cap))
    tile_n = _round_up(tile_n, 8)
    if tile_n >= n:
        tile_n = n                       # single full-extent block
    grid_n = pl.cdiv(n, tile_n)

    kernel = functools.partial(_sign_fused_kernel, n_layers=n_layers,
                               cast_bf16=cast_to_bf16)

    def build(weight_pipeline_mode):
        def const_spec(a):
            if weight_pipeline_mode is None:
                return pl.BlockSpec(a.shape, lambda i: (0, 0))
            return pl.BlockSpec(a.shape, lambda i: (0, 0),
                                pipeline_mode=weight_pipeline_mode)

        in_specs = [pl.BlockSpec(memory_space=pltpu.MemorySpace.SMEM),
                    pl.BlockSpec((tile_n, feat_width), lambda i: (i, 0))]
        in_specs += [const_spec(a) for a in const_args]

        return pl.pallas_call(
            kernel,
            out_shape=jax.ShapeDtypeStruct((n, out_feats), jnp.float32),
            grid_spec=pltpu.PrefetchScalarGridSpec(
                num_scalar_prefetch=0,
                grid=(grid_n,),
                in_specs=in_specs,
                out_specs=pl.BlockSpec((tile_n, out_feats), lambda i: (i, 0)),
            ),
            compiler_params=pltpu.CompilerParams(
                dimension_semantics=("parallel",),
                vmem_limit_bytes=32 * 1024 * 1024,
            ),
        )

    # Weights/biases/alphas are grid-invariant (constant index_map), so they
    # only need a single VMEM buffer; request that, but fall back to default
    # double-buffering if this Pallas version rejects pipeline_mode here.
    try:
        return build(pl.Buffered(1))(*args)
    except Exception:
        return build(None)(*args)


# ------------------------- parameter construction ----------------------------

def _xavier_uniform(key, fan_in, fan_out, gain):
    bound = gain * jnp.sqrt(6.0 / (fan_in + fan_out))
    # stored as [fan_in, fan_out] (transposed vs torch's [out, in])
    return jax.random.uniform(key, (fan_in, fan_out), jnp.float32, -bound, bound)


def make_ffn_params(key, in_feats, hidden, out_feats, n_layers):
    gain = jnp.sqrt(2.0)  # nn.init.calculate_gain('relu')
    dims = ([in_feats, out_feats] if n_layers == 1
            else [in_feats] + [hidden] * (n_layers - 1) + [out_feats])
    weights, biases = [], []
    for i in range(n_layers):
        key, sub = jax.random.split(key)
        weights.append(_xavier_uniform(sub, dims[i], dims[i + 1], gain))
        biases.append(jnp.zeros((1, dims[i + 1]), jnp.float32))
    # PReLU alpha (torch default init is 0.25); use a distinct value per module
    # so per-module alpha routing is actually exercised.
    key, akey = jax.random.split(key)
    alpha = jax.random.uniform(akey, (), jnp.float32, 0.1, 0.4)
    return {"weights": weights, "biases": biases, "alpha": alpha}


def make_sign_params(key, in_feats, hidden, out_feats, num_hops, n_layers):
    key, akey = jax.random.split(key)
    params = {
        "inception": [],
        "prelu_alpha": jax.random.uniform(akey, (), jnp.float32, 0.1, 0.4),
    }
    for _ in range(num_hops):
        key, sub = jax.random.split(key)
        params["inception"].append(
            make_ffn_params(sub, in_feats, hidden, hidden, n_layers))
    key, sub = jax.random.split(key)
    params["project"] = make_ffn_params(
        sub, num_hops * hidden, hidden, out_feats, n_layers)
    return params


# ------------------------------ reference ------------------------------------
# Mirrors the original torch structure (per-hop FFNs -> concat -> PReLU ->
# projection).  operand_dtype=bf16 reproduces the kernel's matmul arithmetic
# (bf16 operands, f32 accumulation) for a tight comparison.

def _ffn_ref(x, p, operand_dtype=None):
    n_layers = len(p["weights"])
    for i, (w, b) in enumerate(zip(p["weights"], p["biases"])):
        if operand_dtype is not None:
            x = jnp.dot(x.astype(operand_dtype), w.astype(operand_dtype),
                        preferred_element_type=jnp.float32) + b
        else:
            x = jnp.dot(x, w) + b
        if i < n_layers - 1:
            x = jnp.where(x >= 0, x, p["alpha"] * x)
    return x


def _sign_ref(feats, params, operand_dtype=None):
    hidden = [_ffn_ref(f, p, operand_dtype)
              for f, p in zip(feats, params["inception"])]
    h = jnp.concatenate(hidden, axis=-1)
    h = jnp.where(h >= 0, h, params["prelu_alpha"] * h)
    return _ffn_ref(h, params["project"], operand_dtype)


# --------------------------------- main ---------------------------------------

if __name__ == "__main__":
    IN_FEATS = 32
    HIDDEN = 32
    OUT_FEATS = 16
    NUM_HOPS = 3
    N_LAYERS = 2

    key = jax.random.PRNGKey(0)
    key, pkey = jax.random.split(key)
    params = make_sign_params(pkey, IN_FEATS, HIDDEN, OUT_FEATS, NUM_HOPS, N_LAYERS)

    # Case 1: N=128, default bf16 operands, multi-step "parallel" grid.
    key, fkey = jax.random.split(key)
    feats = [jax.random.normal(k, (128, IN_FEATS), jnp.float32)
             for k in jax.random.split(fkey, NUM_HOPS)]
    out = jax.block_until_ready(sign_forward(feats, params))
    ref = _sign_ref(feats, params, operand_dtype=jnp.bfloat16)
    assert out.shape == (128, OUT_FEATS)
    assert jnp.allclose(out, ref, atol=5e-4, rtol=5e-4), \
        float(jnp.max(jnp.abs(out - ref)))

    # Case 2: ragged node count (100 not divisible by the tile) -> masked
    # last block, no wrapper-side padding.
    key, fkey = jax.random.split(key)
    feats2 = [jax.random.normal(k, (100, IN_FEATS), jnp.float32)
              for k in jax.random.split(fkey, NUM_HOPS)]
    out2 = jax.block_until_ready(sign_forward(feats2, params, tile_n=64))
    ref2 = _sign_ref(feats2, params, operand_dtype=jnp.bfloat16)
    assert out2.shape == (100, OUT_FEATS)
    assert jnp.allclose(out2, ref2, atol=5e-4, rtol=5e-4), \
        float(jnp.max(jnp.abs(out2 - ref2)))

    # Case 3: f32 operand path (no bf16 cast).  Loose bound only: matmul
    # precision is backend-default on both sides; this just guards against
    # NaNs / gross structural errors on that branch.
    out3 = jax.block_until_ready(
        sign_forward(feats2, params, cast_to_bf16=False))
    ref3 = _sign_ref(feats2, params)
    assert out3.shape == (100, OUT_FEATS)
    assert jnp.allclose(out3, ref3, atol=0.5, rtol=0.5), \
        float(jnp.max(jnp.abs(out3 - ref3)))

    # TODO(synk): dropout / input_drop are identity (eval mode); training-mode
    # dropout would need pltpu.prng_* inside the fused kernel.
    print("KERNEL_OK")
</pallas_src>

<mosaic_0001>
module attributes {stable_mosaic.version = 11 : i64} {
  func.func @_sign_fused_kernel(%arg0: i32, %arg1: memref<2xf32, #tpu.memory_space<smem>>, %arg2: memref<64x96xf32, #tpu.memory_space<vmem>>, %arg3: memref<96x96xbf16, #tpu.memory_space<vmem>>, %arg4: memref<96x96xbf16, #tpu.memory_space<vmem>>, %arg5: memref<1x96xf32, #tpu.memory_space<vmem>>, %arg6: memref<1x96xf32, #tpu.memory_space<vmem>>, %arg7: memref<1x96xf32, #tpu.memory_space<vmem>>, %arg8: memref<96x32xbf16, #tpu.memory_space<vmem>>, %arg9: memref<32x16xbf16, #tpu.memory_space<vmem>>, %arg10: memref<1x32xf32, #tpu.memory_space<vmem>>, %arg11: memref<1x16xf32, #tpu.memory_space<vmem>>, %arg12: memref<64x16xf32, #tpu.memory_space<vmem>>) attributes {dimension_semantics = [#tpu.dimension_semantics<parallel>], iteration_bounds = array<i64: 2>, scalar_prefetch = 0 : i64, scratch_operands = 0 : i64, tpu.core_type = #tpu.core_type<tc>, window_params = [{transform_indices = @transform_0, window_bounds = array<i64: 2>}, {transform_indices = @transform_1, window_bounds = array<i64: 64, 96>}, {pipeline_mode = #tpu.pipeline_mode<synchronous>, transform_indices = @transform_2, window_bounds = array<i64: 96, 96>}, {pipeline_mode = #tpu.pipeline_mode<synchronous>, transform_indices = @transform_3, window_bounds = array<i64: 96, 96>}, {pipeline_mode = #tpu.pipeline_mode<synchronous>, transform_indices = @transform_4, window_bounds = array<i64: 1, 96>}, {pipeline_mode = #tpu.pipeline_mode<synchronous>, transform_indices = @transform_5, window_bounds = array<i64: 1, 96>}, {pipeline_mode = #tpu.pipeline_mode<synchronous>, transform_indices = @transform_6, window_bounds = array<i64: 1, 96>}, {pipeline_mode = #tpu.pipeline_mode<synchronous>, transform_indices = @transform_7, window_bounds = array<i64: 96, 32>}, {pipeline_mode = #tpu.pipeline_mode<synchronous>, transform_indices = @transform_8, window_bounds = array<i64: 32, 16>}, {pipeline_mode = #tpu.pipeline_mode<synchronous>, transform_indices = @transform_9, window_bounds = array<i64: 1, 32>}, {pipeline_mode = #tpu.pipeline_mode<synchronous>, transform_indices = @transform_10, window_bounds = array<i64: 1, 16>}, {transform_indices = @transform_11, window_bounds = array<i64: 64, 16>}]} {
    %c0 = arith.constant 0 : index
    %0 = memref.load %arg1[%c0] : memref<2xf32, #tpu.memory_space<smem>>
    %c1 = arith.constant 1 : index
    %1 = memref.load %arg1[%c1] : memref<2xf32, #tpu.memory_space<smem>>
    %c0_0 = arith.constant 0 : index
    %c0_1 = arith.constant 0 : index
    %2 = vector.load %arg2[%c0_0, %c0_1] : memref<64x96xf32, #tpu.memory_space<vmem>>, vector<64x96xf32>
    %3 = arith.truncf %2 : vector<64x96xf32> to vector<64x96xbf16>
    %c0_2 = arith.constant 0 : index
    %c0_3 = arith.constant 0 : index
    %4 = vector.load %arg3[%c0_2, %c0_3] : memref<96x96xbf16, #tpu.memory_space<vmem>>, vector<96x96xbf16>
    %cst = arith.constant dense<0.000000e+00> : vector<64x96xf32>
    %5 = tpu.matmul %3, %4, %cst {dimension_numbers = #tpu.dot_dimension_numbers<[1], [0], [0], [1], [0, 0, 1, 1], [], []>} : vector<64x96xbf16>, vector<96x96xbf16>, vector<64x96xf32> -> vector<64x96xf32>
    %c0_4 = arith.constant 0 : index
    %c0_5 = arith.constant 0 : index
    %6 = vector.load %arg5[%c0_4, %c0_5] : memref<1x96xf32, #tpu.memory_space<vmem>>, vector<1x96xf32>
    %7 = vector.broadcast %6 : vector<1x96xf32> to vector<64x96xf32>
    %8 = arith.addf %5, %7 : vector<64x96xf32>
    %c0_6 = arith.constant 0 : index
    %c0_7 = arith.constant 0 : index
    %9 = vector.load %arg7[%c0_6, %c0_7] : memref<1x96xf32, #tpu.memory_space<vmem>>, vector<1x96xf32>
    %cst_8 = arith.constant 0.000000e+00 : f32
    %10 = vector.broadcast %cst_8 : f32 to vector<64x96xf32>
    %11 = arith.cmpf oge, %8, %10 : vector<64x96xf32>
    %12 = vector.broadcast %9 : vector<1x96xf32> to vector<64x96xf32>
    %13 = arith.mulf %12, %8 : vector<64x96xf32>
    %14 = arith.select %11, %8, %13 : vector<64x96xi1>, vector<64x96xf32>
    %15 = arith.truncf %14 : vector<64x96xf32> to vector<64x96xbf16>
    %c0_9 = arith.constant 0 : index
    %c0_10 = arith.constant 0 : index
    %16 = vector.load %arg4[%c0_9, %c0_10] : memref<96x96xbf16, #tpu.memory_space<vmem>>, vector<96x96xbf16>
    %cst_11 = arith.constant dense<0.000000e+00> : vector<64x96xf32>
    %17 = tpu.matmul %15, %16, %cst_11 {dimension_numbers = #tpu.dot_dimension_numbers<[1], [0], [0], [1], [0, 0, 1, 1], [], []>} : vector<64x96xbf16>, vector<96x96xbf16>, vector<64x96xf32> -> vector<64x96xf32>
    %c0_12 = arith.constant 0 : index
    %c0_13 = arith.constant 0 : index
    %18 = vector.load %arg6[%c0_12, %c0_13] : memref<1x96xf32, #tpu.memory_space<vmem>>, vector<1x96xf32>
    %19 = vector.broadcast %18 : vector<1x96xf32> to vector<64x96xf32>
    %20 = arith.addf %17, %19 : vector<64x96xf32>
    %cst_14 = arith.constant 0.000000e+00 : f32
    %21 = vector.broadcast %cst_14 : f32 to vector<64x96xf32>
    %22 = arith.cmpf oge, %20, %21 : vector<64x96xf32>
    %23 = vector.broadcast %0 : f32 to vector<64x96xf32>
    %24 = arith.mulf %23, %20 : vector<64x96xf32>
    %25 = arith.select %22, %20, %24 : vector<64x96xi1>, vector<64x96xf32>
    %26 = arith.truncf %25 : vector<64x96xf32> to vector<64x96xbf16>
    %c0_15 = arith.constant 0 : index
    %c0_16 = arith.constant 0 : index
    %27 = vector.load %arg8[%c0_15, %c0_16] : memref<96x32xbf16, #tpu.memory_space<vmem>>, vector<96x32xbf16>
    %cst_17 = arith.constant dense<0.000000e+00> : vector<64x32xf32>
    %28 = tpu.matmul %26, %27, %cst_17 {dimension_numbers = #tpu.dot_dimension_numbers<[1], [0], [0], [1], [0, 0, 1, 1], [], []>} : vector<64x96xbf16>, vector<96x32xbf16>, vector<64x32xf32> -> vector<64x32xf32>
    %c0_18 = arith.constant 0 : index
    %c0_19 = arith.constant 0 : index
    %29 = vector.load %arg10[%c0_18, %c0_19] : memref<1x32xf32, #tpu.memory_space<vmem>>, vector<1x32xf32>
    %30 = vector.broadcast %29 : vector<1x32xf32> to vector<64x32xf32>
    %31 = arith.addf %28, %30 : vector<64x32xf32>
    %cst_20 = arith.constant 0.000000e+00 : f32
    %32 = vector.broadcast %cst_20 : f32 to vector<64x32xf32>
    %33 = arith.cmpf oge, %31, %32 : vector<64x32xf32>
    %34 = vector.broadcast %1 : f32 to vector<64x32xf32>
    %35 = arith.mulf %34, %31 : vector<64x32xf32>
    %36 = arith.select %33, %31, %35 : vector<64x32xi1>, vector<64x32xf32>
    %37 = arith.truncf %36 : vector<64x32xf32> to vector<64x32xbf16>
    %c0_21 = arith.constant 0 : index
    %c0_22 = arith.constant 0 : index
    %38 = vector.load %arg9[%c0_21, %c0_22] : memref<32x16xbf16, #tpu.memory_space<vmem>>, vector<32x16xbf16>
    %cst_23 = arith.constant dense<0.000000e+00> : vector<64x16xf32>
    %39 = tpu.matmul %37, %38, %cst_23 {dimension_numbers = #tpu.dot_dimension_numbers<[1], [0], [0], [1], [0, 0, 1, 1], [], []>} : vector<64x32xbf16>, vector<32x16xbf16>, vector<64x16xf32> -> vector<64x16xf32>
    %c0_24 = arith.constant 0 : index
    %c0_25 = arith.constant 0 : index
    %40 = vector.load %arg11[%c0_24, %c0_25] : memref<1x16xf32, #tpu.memory_space<vmem>>, vector<1x16xf32>
    %41 = vector.broadcast %40 : vector<1x16xf32> to vector<64x16xf32>
    %42 = arith.addf %39, %41 : vector<64x16xf32>
    %c0_26 = arith.constant 0 : index
    %c0_27 = arith.constant 0 : index
    %43 = vector.load %arg12[%c0_26, %c0_27] : memref<64x16xf32, #tpu.memory_space<vmem>>, vector<64x16xf32>
    tpu.vector_store %arg12[%c0_26, %c0_27], %42 {strides = array<i32>} : memref<64x16xf32, #tpu.memory_space<vmem>>, vector<64x16xf32>,
    return
  }
  func.func @transform_0(%arg0: i32) -> i32 {
    %c0_i32 = arith.constant 0 : i32
    %c0_i32_0 = arith.constant 0 : i32
    return %c0_i32 : i32
  }
  func.func @transform_1(%arg0: i32) -> (i32, i32) {
    %c0_i32 = arith.constant 0 : i32
    %c0_i32_0 = arith.constant 0 : i32
    return %arg0, %c0_i32 : i32, i32
  }
  func.func @transform_2(%arg0: i32) -> (i32, i32) {
    %c0_i32 = arith.constant 0 : i32
    %c0_i32_0 = arith.constant 0 : i32
    %c0_i32_1 = arith.constant 0 : i32
    return %c0_i32, %c0_i32_0 : i32, i32
  }
  func.func @transform_3(%arg0: i32) -> (i32, i32) {
    %c0_i32 = arith.constant 0 : i32
    %c0_i32_0 = arith.constant 0 : i32
    %c0_i32_1 = arith.constant 0 : i32
    return %c0_i32, %c0_i32_0 : i32, i32
  }
  func.func @transform_4(%arg0: i32) -> (i32, i32) {
    %c0_i32 = arith.constant 0 : i32
    %c0_i32_0 = arith.constant 0 : i32
    %c0_i32_1 = arith.constant 0 : i32
    return %c0_i32, %c0_i32_0 : i32, i32
  }
  func.func @transform_5(%arg0: i32) -> (i32, i32) {
    %c0_i32 = arith.constant 0 : i32
    %c0_i32_0 = arith.constant 0 : i32
    %c0_i32_1 = arith.constant 0 : i32
    return %c0_i32, %c0_i32_0 : i32, i32
  }
  func.func @transform_6(%arg0: i32) -> (i32, i32) {
    %c0_i32 = arith.constant 0 : i32
    %c0_i32_0 = arith.constant 0 : i32
    %c0_i32_1 = arith.constant 0 : i32
    return %c0_i32, %c0_i32_0 : i32, i32
  }
  func.func @transform_7(%arg0: i32) -> (i32, i32) {
    %c0_i32 = arith.constant 0 : i32
    %c0_i32_0 = arith.constant 0 : i32
    %c0_i32_1 = arith.constant 0 : i32
    return %c0_i32, %c0_i32_0 : i32, i32
  }
  func.func @transform_8(%arg0: i32) -> (i32, i32) {
    %c0_i32 = arith.constant 0 : i32
    %c0_i32_0 = arith.constant 0 : i32
    %c0_i32_1 = arith.constant 0 : i32
    return %c0_i32, %c0_i32_0 : i32, i32
  }
  func.func @transform_9(%arg0: i32) -> (i32, i32) {
    %c0_i32 = arith.constant 0 : i32
    %c0_i32_0 = arith.constant 0 : i32
    %c0_i32_1 = arith.constant 0 : i32
    return %c0_i32, %c0_i32_0 : i32, i32
  }
  func.func @transform_10(%arg0: i32) -> (i32, i32) {
    %c0_i32 = arith.constant 0 : i32
    %c0_i32_0 = arith.constant 0 : i32
    %c0_i32_1 = arith.constant 0 : i32
    return %c0_i32, %c0_i32_0 : i32, i32
  }
  func.func @transform_11(%arg0: i32) -> (i32, i32) {
    %c0_i32 = arith.constant 0 : i32
    %c0_i32_0 = arith.constant 0 : i32
    return %arg0, %c0_i32 : i32, i32
  }
}

module attributes {stable_mosaic.version = 11 : i64} {
  func.func @_sign_fused_kernel(%arg0: i32, %arg1: memref<2xf32, #tpu.memory_space<smem>>, %arg2: memref<64x96xf32, #tpu.memory_space<vmem>>, %arg3: memref<96x96xbf16, #tpu.memory_space<vmem>>, %arg4: memref<96x96xbf16, #tpu.memory_space<vmem>>, %arg5: memref<1x96xf32, #tpu.memory_space<vmem>>, %arg6: memref<1x96xf32, #tpu.memory_space<vmem>>, %arg7: memref<1x96xf32, #tpu.memory_space<vmem>>, %arg8: memref<96x32xbf16, #tpu.memory_space<vmem>>, %arg9: memref<32x16xbf16, #tpu.memory_space<vmem>>, %arg10: memref<1x32xf32, #tpu.memory_space<vmem>>, %arg11: memref<1x16xf32, #tpu.memory_space<vmem>>, %arg12: memref<64x16xf32, #tpu.memory_space<vmem>>) attributes {dimension_semantics = [#tpu.dimension_semantics<parallel>], iteration_bounds = array<i64: 2>, scalar_prefetch = 0 : i64, scratch_operands = 0 : i64, tpu.core_type = #tpu.core_type<tc>, window_params = [{transform_indices = @transform_0, window_bounds = array<i64: 2>}, {transform_indices = @transform_1, window_bounds = array<i64: 64, 96>}, {pipeline_mode = #tpu.pipeline_mode<synchronous>, transform_indices = @transform_2, window_bounds = array<i64: 96, 96>}, {pipeline_mode = #tpu.pipeline_mode<synchronous>, transform_indices = @transform_3, window_bounds = array<i64: 96, 96>}, {pipeline_mode = #tpu.pipeline_mode<synchronous>, transform_indices = @transform_4, window_bounds = array<i64: 1, 96>}, {pipeline_mode = #tpu.pipeline_mode<synchronous>, transform_indices = @transform_5, window_bounds = array<i64: 1, 96>}, {pipeline_mode = #tpu.pipeline_mode<synchronous>, transform_indices = @transform_6, window_bounds = array<i64: 1, 96>}, {pipeline_mode = #tpu.pipeline_mode<synchronous>, transform_indices = @transform_7, window_bounds = array<i64: 96, 32>}, {pipeline_mode = #tpu.pipeline_mode<synchronous>, transform_indices = @transform_8, window_bounds = array<i64: 32, 16>}, {pipeline_mode = #tpu.pipeline_mode<synchronous>, transform_indices = @transform_9, window_bounds = array<i64: 1, 32>}, {pipeline_mode = #tpu.pipeline_mode<synchronous>, transform_indices = @transform_10, window_bounds = array<i64: 1, 16>}, {transform_indices = @transform_11, window_bounds = array<i64: 64, 16>}]} {
    %c0 = arith.constant 0 : index
    %0 = memref.load %arg1[%c0] : memref<2xf32, #tpu.memory_space<smem>>
    %c1 = arith.constant 1 : index
    %1 = memref.load %arg1[%c1] : memref<2xf32, #tpu.memory_space<smem>>
    %c0_0 = arith.constant 0 : index
    %c0_1 = arith.constant 0 : index
    %2 = vector.load %arg2[%c0_0, %c0_1] : memref<64x96xf32, #tpu.memory_space<vmem>>, vector<64x96xf32>
    %3 = arith.truncf %2 : vector<64x96xf32> to vector<64x96xbf16>
    %c0_2 = arith.constant 0 : index
    %c0_3 = arith.constant 0 : index
    %4 = vector.load %arg3[%c0_2, %c0_3] : memref<96x96xbf16, #tpu.memory_space<vmem>>, vector<96x96xbf16>
    %cst = arith.constant dense<0.000000e+00> : vector<64x96xf32>
    %5 = tpu.matmul %3, %4, %cst {dimension_numbers = #tpu.dot_dimension_numbers<[1], [0], [0], [1], [0, 0, 1, 1], [], []>} : vector<64x96xbf16>, vector<96x96xbf16>, vector<64x96xf32> -> vector<64x96xf32>
    %c0_4 = arith.constant 0 : index
    %c0_5 = arith.constant 0 : index
    %6 = vector.load %arg5[%c0_4, %c0_5] : memref<1x96xf32, #tpu.memory_space<vmem>>, vector<1x96xf32>
    %7 = vector.broadcast %6 : vector<1x96xf32> to vector<64x96xf32>
    %8 = arith.addf %5, %7 : vector<64x96xf32>
    %c0_6 = arith.constant 0 : index
    %c0_7 = arith.constant 0 : index
    %9 = vector.load %arg7[%c0_6, %c0_7] : memref<1x96xf32, #tpu.memory_space<vmem>>, vector<1x96xf32>
    %cst_8 = arith.constant 0.000000e+00 : f32
    %10 = vector.broadcast %cst_8 : f32 to vector<64x96xf32>
    %11 = arith.cmpf oge, %8, %10 : vector<64x96xf32>
    %12 = vector.broadcast %9 : vector<1x96xf32> to vector<64x96xf32>
    %13 = arith.mulf %12, %8 : vector<64x96xf32>
    %14 = arith.select %11, %8, %13 : vector<64x96xi1>, vector<64x96xf32>
    %15 = arith.truncf %14 : vector<64x96xf32> to vector<64x96xbf16>
    %c0_9 = arith.constant 0 : index
    %c0_10 = arith.constant 0 : index
    %16 = vector.load %arg4[%c0_9, %c0_10] : memref<96x96xbf16, #tpu.memory_space<vmem>>, vector<96x96xbf16>
    %cst_11 = arith.constant dense<0.000000e+00> : vector<64x96xf32>
    %17 = tpu.matmul %15, %16, %cst_11 {dimension_numbers = #tpu.dot_dimension_numbers<[1], [0], [0], [1], [0, 0, 1, 1], [], []>} : vector<64x96xbf16>, vector<96x96xbf16>, vector<64x96xf32> -> vector<64x96xf32>
    %c0_12 = arith.constant 0 : index
    %c0_13 = arith.constant 0 : index
    %18 = vector.load %arg6[%c0_12, %c0_13] : memref<1x96xf32, #tpu.memory_space<vmem>>, vector<1x96xf32>
    %19 = vector.broadcast %18 : vector<1x96xf32> to vector<64x96xf32>
    %20 = arith.addf %17, %19 : vector<64x96xf32>
    %cst_14 = arith.constant 0.000000e+00 : f32
    %21 = vector.broadcast %cst_14 : f32 to vector<64x96xf32>
    %22 = arith.cmpf oge, %20, %21 : vector<64x96xf32>
    %23 = vector.broadcast %0 : f32 to vector<64x96xf32>
    %24 = arith.mulf %23, %20 : vector<64x96xf32>
    %25 = arith.select %22, %20, %24 : vector<64x96xi1>, vector<64x96xf32>
    %26 = arith.truncf %25 : vector<64x96xf32> to vector<64x96xbf16>
    %c0_15 = arith.constant 0 : index
    %c0_16 = arith.constant 0 : index
    %27 = vector.load %arg8[%c0_15, %c0_16] : memref<96x32xbf16, #tpu.memory_space<vmem>>, vector<96x32xbf16>
    %cst_17 = arith.constant dense<0.000000e+00> : vector<64x32xf32>
    %28 = tpu.matmul %26, %27, %cst_17 {dimension_numbers = #tpu.dot_dimension_numbers<[1], [0], [0], [1], [0, 0, 1, 1], [], []>} : vector<64x96xbf16>, vector<96x32xbf16>, vector<64x32xf32> -> vector<64x32xf32>
    %c0_18 = arith.constant 0 : index
    %c0_19 = arith.constant 0 : index
    %29 = vector.load %arg10[%c0_18, %c0_19] : memref<1x32xf32, #tpu.memory_space<vmem>>, vector<1x32xf32>
    %30 = vector.broadcast %29 : vector<1x32xf32> to vector<64x32xf32>
    %31 = arith.addf %28, %30 : vector<64x32xf32>
    %cst_20 = arith.constant 0.000000e+00 : f32
    %32 = vector.broadcast %cst_20 : f32 to vector<64x32xf32>
    %33 = arith.cmpf oge, %31, %32 : vector<64x32xf32>
    %34 = vector.broadcast %1 : f32 to vector<64x32xf32>
    %35 = arith.mulf %34, %31 : vector<64x32xf32>
    %36 = arith.select %33, %31, %35 : vector<64x32xi1>, vector<64x32xf32>
    %37 = arith.truncf %36 : vector<64x32xf32> to vector<64x32xbf16>
    %c0_21 = arith.constant 0 : index
    %c0_22 = arith.constant 0 : index
    %38 = vector.load %arg9[%c0_21, %c0_22] : memref<32x16xbf16, #tpu.memory_space<vmem>>, vector<32x16xbf16>
    %cst_23 = arith.constant dense<0.000000e+00> : vector<64x16xf32>
    %39 = tpu.matmul %37, %38, %cst_23 {dimension_numbers = #tpu.dot_dimension_numbers<[1], [0], [0], [1], [0, 0, 1, 1], [], []>} : vector<64x32xbf16>, vector<32x16xbf16>, vector<64x16xf32> -> vector<64x16xf32>
    %c0_24 = arith.constant 0 : index
    %c0_25 = arith.constant 0 : index
    %40 = vector.load %arg11[%c0_24, %c0_25] : memref<1x16xf32, #tpu.memory_space<vmem>>, vector<1x16xf32>
    %41 = vector.broadcast %40 : vector<1x16xf32> to vector<64x16xf32>
    %42 = arith.addf %39, %41 : vector<64x16xf32>
    %c0_26 = arith.constant 0 : index
    %c0_27 = arith.constant 0 : index
    %43 = vector.load %arg12[%c0_26, %c0_27] : memref<64x16xf32, #tpu.memory_space<vmem>>, vector<64x16xf32>
    tpu.vector_store %arg12[%c0_26, %c0_27], %42 {strides = array<i32>} : memref<64x16xf32, #tpu.memory_space<vmem>>, vector<64x16xf32>,
    return
  }
  func.func @transform_0(%arg0: i32) -> i32 {
    %c0_i32 = arith.constant 0 : i32
    %c0_i32_0 = arith.constant 0 : i32
    return %c0_i32 : i32
  }
  func.func @transform_1(%arg0: i32) -> (i32, i32) {
    %c0_i32 = arith.constant 0 : i32
    %c0_i32_0 = arith.constant 0 : i32
    return %arg0, %c0_i32 : i32, i32
  }
  func.func @transform_2(%arg0: i32) -> (i32, i32) {
    %c0_i32 = arith.constant 0 : i32
    %c0_i32_0 = arith.constant 0 : i32
    %c0_i32_1 = arith.constant 0 : i32
    return %c0_i32, %c0_i32_0 : i32, i32
  }
  func.func @transform_3(%arg0: i32) -> (i32, i32) {
    %c0_i32 = arith.constant 0 : i32
    %c0_i32_0 = arith.constant 0 : i32
    %c0_i32_1 = arith.constant 0 : i32
    return %c0_i32, %c0_i32_0 : i32, i32
  }
  func.func @transform_4(%arg0: i32) -> (i32, i32) {
    %c0_i32 = arith.constant 0 : i32
    %c0_i32_0 = arith.constant 0 : i32
    %c0_i32_1 = arith.constant 0 : i32
    return %c0_i32, %c0_i32_0 : i32, i32
  }
  func.func @transform_5(%arg0: i32) -> (i32, i32) {
    %c0_i32 = arith.constant 0 : i32
    %c0_i32_0 = arith.constant 0 : i32
    %c0_i32_1 = arith.constant 0 : i32
    return %c0_i32, %c0_i32_0 : i32, i32
  }
  func.func @transform_6(%arg0: i32) -> (i32, i32) {
    %c0_i32 = arith.constant 0 : i32
    %c0_i32_0 = arith.constant 0 : i32
    %c0_i32_1 = arith.constant 0 : i32
    return %c0_i32, %c0_i32_0 : i32, i32
  }
  func.func @transform_7(%arg0: i32) -> (i32, i32) {
    %c0_i32 = arith.constant 0 : i32
    %c0_i32_0 = arith.constant 0 : i32
    %c0_i32_1 = arith.constant 0 : i32
    return %c0_i32, %c0_i32_0 : i32, i32
  }
  func.func @transform_8(%arg0: i32) -> (i32, i32) {
    %c0_i32 = arith.constant 0 : i32
    %c0_i32_0 = arith.constant 0 : i32
    %c0_i32_1 = arith.constant 0 : i32
    return %c0_i32, %c0_i32_0 : i32, i32
  }
  func.func @transform_9(%arg0: i32) -> (i32, i32) {
    %c0_i32 = arith.constant 0 : i32
    %c0_i32_0 = arith.constant 0 : i32
    %c0_i32_1 = arith.constant 0 : i32
    return %c0_i32, %c0_i32_0 : i32, i32
  }
  func.func @transform_10(%arg0: i32) -> (i32, i32) {
    %c0_i32 = arith.constant 0 : i32
    %c0_i32_0 = arith.constant 0 : i32
    %c0_i32_1 = arith.constant 0 : i32
    return %c0_i32, %c0_i32_0 : i32, i32
  }
  func.func @transform_11(%arg0: i32) -> (i32, i32) {
    %c0_i32 = arith.constant 0 : i32
    %c0_i32_0 = arith.constant 0 : i32
    return %arg0, %c0_i32 : i32, i32
  }
}

</mosaic_0001>

<bundles_post_ra>
// kernel: tpu_custom_call.1
= control target key start
LH: loop header
LB: loop body
LE: loop exit
PB: predicated region body
PF: predicated region fallthrough
CT: control target
= control target key end

     0   :  { %16 = vsyncpa [#allocation3], 0  ;;  %s1377_s17 = smov 0   ;;  %s1531_s0 = inlined_call_operand.vmem [shape: f32[2], index: 0, kind: input, shape index: {}]   ;;  %s1532_s1 = inlined_call_operand.vmem [shape: f32[128,96], index: 1, kind: input, shape index: {}]   ;;  %s1533_s2 = inlined_call_operand.vmem [shape: bf16[96,96], index: 2, kind: input, shape index: {}]   ;;  %s1534_s3 = inlined_call_operand.vmem [shape: bf16[96,96], index: 3, kind: input, shape index: {}]   ;;  %s1535_s4 = inlined_call_operand.vmem [shape: f32[1,96], index: 4, kind: input, shape index: {}]   ;;  %s1536_s5 = inlined_call_operand.vmem [shape: f32[1,96], index: 5, kind: input, shape index: {}]   ;;  %s1537_s6 = inlined_call_operand.vmem [shape: f32[1,96], index: 6, kind: input, shape index: {}]   ;;  %s1538_s7 = inlined_call_operand.vmem [shape: bf16[96,32], index: 7, kind: input, shape index: {}]   ;;  %s1539_s8 = inlined_call_operand.vmem [shape: bf16[32,16], index: 8, kind: input, shape index: {}]   ;;  %s1540_s9 = inlined_call_operand.vmem [shape: f32[1,32], index: 9, kind: input, shape index: {}]   ;;  %s1541_s10 = inlined_call_operand.vmem [shape: f32[1,16], index: 10, kind: input, shape index: {}]   ;;  %s1542_s11 = inlined_call_operand.vmem [shape: f32[128,16], index: 11, kind: output, shape index: {}]  }
   0x1 LB: > { %s1087_s18 = sadd.s32 4294967295, %s1314_s17   ;;  %p1089_p0 = scmp.ge.s32.totalorder %s1314_s17, 1  ;;  %s1314_s17 = sphi %s1377_s17, %s22_s17  }
   0x2   : > { %p289_p1 = scmp.lt.s32.totalorder %s1314_s17, 3  ;;  %s302_s21 = sshll.u32 %s1531_s0, 4  ;;  %s303_s21 = int_to_ptr.vmem [resolvable:$true] %s302_s21 }
   0x3   : > { %p1392_p3 = scmp.eq.s32.totalorder %s1087_s18, 0  ;;  %s1289_s24 = scalar_lea.vmem %s303_s21, 16 }
   0x4   : > { %p1388_p2 = pnand %p1089_p0, %p289_p1  ;;  %p1290_p6 = scmp.ne.s32.totalorder %s303_s21, %s1289_s24 }
   0x5   : > { %p1297_p10 = scmp.lt.s32.totalorder %s303_s21, %s303_s21  ;;  %p1298_p11 = scmp.lt.s32.totalorder %s1289_s24, %s1289_s24 }
   0x6   : > { %p1254_p4 = pneg %p1388_p2 }
   0x7   : > { %p1299_p12 = por %p1298_p11, %p1297_p10 }
   0x8   : > { %p1255_p5 = pnand %p1392_p3, %p1254_p4 }
   0xa   : > { %p1291_p7 = pneg %p1255_p5 }
   0xc   : > { %p1292_p8 = pnand %p1291_p7, %p1290_p6 }
   0xe   : > { %p1293_p9 = pneg %p1292_p8 }
  0x10   : > { %p1300_p13 = pnand %p1299_p12, %p1293_p9 }
  0x12   : > { %1303 = shalt.err (!%p1300_p13)
}
  0x13   : > { %s1316_s25 = smov [#allocation2]   ;;  %351 = sbr.rel (%p1388_p2) target bundleno = 949 (0x3b5), region = 64 }
  0x14   : > { %1257 = dma.vmem_to_smem (!%p1255_p5), %s303_s21, 16, %s1316_s25, [#allocation3]  }
  0x1a   : > { %1309 = dma.done.wait (%p1392_p3), [#allocation3], 16  }
  0x1b   : > { %1311 = vsyncadd (%p1392_p3), [#allocation3], 4294967280 }
  0x1c   : > { %357 = sfence }
  0x1d   : > { %v1269_v0 = vld [vmem:[%s1533_s2] sm:$0xff]   ;;  %s1094_s28 = sshll.u32 %s1087_s18, 3  ;;  %v1270_v1 = vld [vmem:[%s1533_s2 + $0x8] sm:$0xff]   ;;  %v1271_v2 = vld [vmem:[%s1533_s2 + $0x10] sm:$0xff]   ;;  %vm474_vm0 = vcmask 785408   ;;  %s405_s23 = sld [smem:[#allocation2]] }
  0x1e   : > { %p393_p0 = scmp.lt.s32.totalorder %s1094_s28, 15  ;;  %1178 = vmatprep.subr.bf16.mxu0 %v1269_v0  ;;  %v1275_v3 = vld [vmem:[%s1534_s3] sm:$0xff]   ;;  %v1272_v6 = vld [vmem:[%s1533_s2 + $0x18] sm:$0xff]   ;;  %v1276_v9 = vld [vmem:[%s1534_s3 + $0x8] sm:$0xff]   ;;  %s1098_s29 = sld [smem:[#allocation2 + $0x1]] }
  0x1f   : > { %1179 = vmatpush3.bf16.msra.mxu0 %v1269_v0  ;;  %1198 = vmatprep.subr.bf16.mxu1 %v1275_v3  ;;  %v1273_v8 = vld [vmem:[%s1533_s2 + $0x20] sm:$0xff]   ;;  %v1277_v10 = vld [vmem:[%s1534_s3 + $0x10] sm:$0xff]   ;;  %v1274_v11 = vld [vmem:[%s1533_s2 + $0x28] sm:$0xff]  }
  0x20   : > { %s1546_s28 = smov (!%p393_p0, %s1094_s28), 15  ;;  %1180 = vmatprep.subr.bf16.mxu0 %v1270_v1  ;;  %1199 = vmatpush3.bf16.msra.mxu1 %v1275_v3  ;;  %v1278_v21 = vld [vmem:[%s1534_s3 + $0x18] sm:$0xff]   ;;  %v1279_v22 = vld [vmem:[%s1534_s3 + $0x20] sm:$0xff]   ;;  %v1280_v23 = vld [vmem:[%s1534_s3 + $0x28] sm:$0xff]  }
  0x21   : > { %s1095_s14 = sshll.u32 %s1546_s28, 3  ;;  %1200 = vmatprep.subr.bf16.mxu1 %v1276_v9  ;;  %v1281_v24 = vld [vmem:[%s1538_s7] sm:$0xff]   ;;  %v1282_v25 = vld [vmem:[%s1538_s7 + $0x8] sm:$0xff]   ;;  %v1283_v26 = vld [vmem:[%s1538_s7 + $0x10] sm:$0xff]  }
  0x22   : > { %s1423_s18 = scalar_lea.vmem %s1532_s1, %s1095_s14  ;;  %v1099_v27 = vld [vmem:[%s1535_s4] ss:$0 sm:$0xff]  ;;  %v1286_v3 = vld [vmem:[%s1538_s7 + $0x28] sm:$0xff]   ;;  %s402_s20 = scalar_lea.vmem %s1542_s11, %s1095_s14 }
  0x23   : > { %1181 = vmatpush3.bf16.msra.mxu0 %v1270_v1  ;;  %v407_v4 = vld [vmem:[%s1423_s18] sm:$0xff]  ;;  %v408_v5 = vld [vmem:[%s1423_s18 + $0x8] sm:$0xff]  ;;  %v409_v12 = vld [vmem:[%s1423_s18 + $0x10] sm:$0xff] }
  0x24   : > { %1182 = vmatprep.subr.bf16.mxu0 %v1271_v2  ;;  %v415_v7 = vpack.c.bf16 %v408_v5, %v407_v4  ;;  %1201 = vmatpush3.bf16.msra.mxu1 %v1276_v9  ;;  %v410_v13 = vld [vmem:[%s1423_s18 + $0x18] sm:$0xff]  ;;  %v411_v14 = vld [vmem:[%s1423_s18 + $0x20] sm:$0xff]  ;;  %v412_v15 = vld [vmem:[%s1423_s18 + $0x28] sm:$0xff] }
  0x25   : > { %1202 = vmatprep.subr.bf16.mxu1 %v1277_v10  ;;  %v416_v16 = vpack.c.bf16 %v410_v13, %v409_v12  ;;  %v417_v17 = vpack.c.bf16 %v412_v15, %v411_v14  ;;  %v413_v18 = vld [vmem:[%s1423_s18 + $0x30] sm:$0xff]  ;;  %v414_v19 = vld [vmem:[%s1423_s18 + $0x38] sm:$0xff]  ;;  %v1110_v29 = vld [vmem:[%s1537_s6] ss:$0 sm:$0xff] }
  0x26   : > { %1190 = vmatprep.mubr.msk.bf16.mxu0 %vm474_vm0, %v415_v7  ;;  %v418_v20 = vpack.c.bf16 %v414_v19, %v413_v18  ;;  %v1284_v1 = vld [vmem:[%s1538_s7 + $0x18] sm:$0xff]   ;;  %v1287_v4 = vld [vmem:[%s1539_s8] sm:$0xff]   ;;  %v727_v7 = vstv %s405_s23 }
  0x27   : > { %1183 = vmatpush3.bf16.msra.mxu0 %v1271_v2  ;;  %v1285_v2 = vld [vmem:[%s1538_s7 + $0x20] sm:$0xff]  }
  0x28   : > { %1184 = vmatprep.subr.bf16.mxu0 %v1272_v6  ;;  %1203 = vmatpush3.bf16.msra.mxu1 %v1277_v10  ;;  %v1111_v5 = vld [vmem:[%s1536_s5] ss:$0 sm:$0xff] }
  0x29   : > { %1204 = vmatprep.subr.bf16.mxu1 %v1278_v21 }
  0x2b   : > { %1185 = vmatpush3.bf16.msra.mxu0 %v1272_v6 }
  0x2c   : > { %1186 = vmatprep.subr.bf16.mxu0 %v1273_v8  ;;  %1205 = vmatpush3.bf16.msra.mxu1 %v1278_v21 }
  0x2d   : > { %1206 = vmatprep.subr.bf16.mxu1 %v1279_v22 }
  0x2f   : > { %1187 = vmatpush3.bf16.msra.mxu0 %v1273_v8 }
  0x30   : > { %1188 = vmatprep.subr.bf16.mxu0 %v1274_v11  ;;  %1207 = vmatpush3.bf16.msra.mxu1 %v1279_v22 }
  0x31   : > { %1208 = vmatprep.subr.bf16.mxu1 %v1280_v23 }
  0x33   : > { %1189 = vmatpush3.bf16.msra.mxu0 %v1274_v11 }
  0x34   : > { %1209 = vmatpush3.bf16.msra.mxu1 %v1280_v23  ;;  %1218 = vmatprep.subr.bf16.mxu0 %v1281_v24 }
  0x35   : > { %1238 = vmatprep.subr.bf16.mxu1 %v1287_v4 }
  0x36   : > { %1191 = vmatmul.mubr.msk.bf16.vlgmr.msra.gmra.mrb[0].mxu0 %vm474_vm0, %v416_v16 }
  0x37   : > { %1194 = vmatprep.mubr.msk.bf16.mxu0 %vm474_vm0, %v417_v17  ;;  %1219 = vmatpush3.bf16.msra.mxu0 %v1281_v24 }
  0x38   : > { %1220 = vmatprep.subr.bf16.mxu0 %v1282_v25 }
  0x3b   : > { %1221 = vmatpush3.bf16.msra.mxu0 %v1282_v25 }
  0x3c   : > { %1222 = vmatprep.subr.bf16.mxu0 %v1283_v26 }
  0x3e   : > { %1195 = vmatmul.mubr.msk.bf16.gmra.mrb[4].mxu0 %vm474_vm0, %v418_v20 }
  0x3f   : > { %1223 = vmatpush3.bf16.msra.mxu0 %v1283_v26 }
  0x40   : > { %1224 = vmatprep.subr.bf16.mxu0 %v1284_v1 }
  0x43   : > { %1225 = vmatpush3.bf16.msra.mxu0 %v1284_v1 }
  0x44   : > { %1226 = vmatprep.subr.bf16.mxu0 %v1285_v2 }
  0x47   : > { %1227 = vmatpush3.bf16.msra.mxu0 %v1285_v2 }
  0x48   : > { %1228 = vmatprep.subr.bf16.mxu0 %v1286_v3 }
  0x4b   : > { %1229 = vmatpush3.bf16.msra.mxu0 %v1286_v3 }
 0x109   : > { %v1192_v28 = vpop.f32.mrb[0].mxu0 }
 0x10a   : > { %v530_v30 = vadd.f32 %v1192_v28, %v1099_v27  ;;  %v521_v31 = vpop.f32.mrb[1].mxu0 }
 0x10b   : > { %v522_v32 = vadd.f32 %v1099_v27, %v521_v31  ;;  %v1193_v33 = vpop.f32.mrb[2].mxu0 }
 0x10c   : > { %v569_v34 = vmul.f32 %v1110_v29, %v530_v30  ;;  %v533_v35 = vadd.f32 %v1193_v33, %v1099_v27  ;;  %v524_v36 = vpop.f32.mrb[3].mxu0  ;;  %vm555_vm1 = vcmp.ge.f32.partialorder %v530_v30, 0.0 }
 0x10d   : > { %v567_v37 = vmul.f32 %v1110_v29, %v522_v32  ;;  %v525_v38 = vadd.f32 %v1099_v27, %v524_v36  ;;  %vm553_vm3 = vcmp.ge.f32.partialorder %v522_v32, 0.0 }
 0x10e   : > { %vm556_vm2 = vcmp.ge.f32.partialorder %v533_v35, 0.0  ;;  %v570_v39 = vmul.f32 %v1110_v29, %v533_v35  ;;  %v577_v41 = vsel %vm555_vm1, %v530_v30, %v569_v34 }
 0x10f   : > { %v568_v40 = vmul.f32 %v1110_v29, %v525_v38  ;;  %vm554_vm4 = vcmp.ge.f32.partialorder %v525_v38, 0.0  ;;  %v575_v45 = vsel %vm553_vm3, %v522_v32, %v567_v37 }
 0x110   : > { %v578_v42 = vsel %vm556_vm2, %v533_v35, %v570_v39 }
 0x111   : > { %v584_v43 = vpack.c.bf16 %v578_v42, %v577_v41  ;;  %v1196_v44 = vpop.f32.mrb[4].mxu0  ;;  %v576_v46 = vsel %vm554_vm4, %v525_v38, %v568_v40 }
 0x112   : > { %v546_v47 = vadd.f32 %v1196_v44, %v1099_v27  ;;  %v537_v48 = vpop.f32.mrb[5].mxu0  ;;  %v583_v49 = vpack.c.bf16 %v576_v46, %v575_v45  ;;  %v1122_v44 = vld [vmem:[%s1540_s9] ss:$0 sm:$0xff]  ;;  %v888_v46 = vstv %s1098_s29 }
 0x113   : > { %v538_v50 = vadd.f32 %v1099_v27, %v537_v48  ;;  %v1197_v51 = vpop.f32.mrb[6].mxu0 }
 0x114   : > { %v573_v52 = vmul.f32 %v1110_v29, %v546_v47  ;;  %v549_v53 = vadd.f32 %v1197_v51, %v1099_v27  ;;  %v540_v54 = vpop.f32.mrb[7].mxu0  ;;  %1210 = vmatprep.mubr.msk.bf16.mxu1 %vm474_vm0, %v583_v49  ;;  %vm559_vm5 = vcmp.ge.f32.partialorder %v546_v47, 0.0 }
 0x115   : > { %v571_v55 = vmul.f32 %v1110_v29, %v538_v50  ;;  %v541_v56 = vadd.f32 %v1099_v27, %v540_v54  ;;  %1211 = vmatmul.mubr.msk.bf16.vlgmr.msra.gmra.mrb[0].mxu1 %vm474_vm0, %v584_v43  ;;  %vm557_vm6 = vcmp.ge.f32.partialorder %v538_v50, 0.0  ;;  %v1288_v43 = vld [vmem:[%s1539_s8 + $0x8] sm:$0xff]  }
 0x116   : > { %vm560_vm7 = vcmp.ge.f32.partialorder %v549_v53, 0.0  ;;  %v574_v57 = vmul.f32 %v1110_v29, %v549_v53  ;;  %v581_v59 = vsel %vm559_vm5, %v546_v47, %v573_v52  ;;  %1239 = vmatpush3.bf16.msra.mxu1 %v1287_v4  ;;  %vm932_vm5 = vcmask 261120  }
 0x117   : > { %vm558_vm8 = vcmp.ge.f32.partialorder %v541_v56, 0.0  ;;  %v572_v58 = vmul.f32 %v1110_v29, %v541_v56  ;;  %v579_v61 = vsel %vm557_vm6, %v538_v50, %v571_v55  ;;  %1240 = vmatprep.subr.bf16.mxu1 %v1288_v43 }
 0x118   : > { %v582_v60 = vsel %vm560_vm7, %v549_v53, %v574_v57 }
 0x119   : > { %v586_v62 = vpack.c.bf16 %v582_v60, %v581_v59  ;;  %v580_v63 = vsel %vm558_vm8, %v541_v56, %v572_v58 }
 0x11a   : > { %v585_v0 = vpack.c.bf16 %v580_v63, %v579_v61  ;;  %1241 = vmatpush3.bf16.msra.mxu1 %v1288_v43 }
 0x11c   : > { %1214 = vmatprep.mubr.msk.bf16.mxu1 %vm474_vm0, %v585_v0 }
 0x11d   : > { %1215 = vmatmul.mubr.msk.bf16.gmra.mrb[4].mxu1 %vm474_vm0, %v586_v62 }
 0x1e8   : > { %v1212_v6 = vpop.f32.mrb[0].mxu1 }
 0x1e9   : > { %v697_v8 = vadd.f32 %v1212_v6, %v1111_v5  ;;  %v688_v9 = vpop.f32.mrb[1].mxu1 }
 0x1ea   : > { %v689_v10 = vadd.f32 %v1111_v5, %v688_v9  ;;  %v1213_v11 = vpop.f32.mrb[2].mxu1 }
 0x1eb   : > { %v730_v12 = vmul.f32 %v727_v7, %v697_v8  ;;  %v700_v13 = vadd.f32 %v1213_v11, %v1111_v5  ;;  %v691_v14 = vpop.f32.mrb[3].mxu1  ;;  %vm721_vm9 = vcmp.ge.f32.partialorder %v697_v8, 0.0 }
 0x1ec   : > { %v728_v15 = vmul.f32 %v727_v7, %v689_v10  ;;  %v692_v16 = vadd.f32 %v1111_v5, %v691_v14  ;;  %vm719_vm10 = vcmp.ge.f32.partialorder %v689_v10, 0.0 }
 0x1ed   : > { %vm722_vm11 = vcmp.ge.f32.partialorder %v700_v13, 0.0  ;;  %v731_v17 = vmul.f32 %v727_v7, %v700_v13  ;;  %v738_v19 = vsel %vm721_vm9, %v697_v8, %v730_v12 }
 0x1ee   : > { %vm720_vm12 = vcmp.ge.f32.partialorder %v692_v16, 0.0  ;;  %v729_v18 = vmul.f32 %v727_v7, %v692_v16  ;;  %v736_v21 = vsel %vm719_vm10, %v689_v10, %v728_v15  ;;  %vm1010_vm10 = vcmask 130048  }
 0x1ef   : > { %v739_v20 = vsel %vm722_vm11, %v700_v13, %v731_v17 }
 0x1f0   : > { %v745_v22 = vpack.c.bf16 %v739_v20, %v738_v19  ;;  %v737_v23 = vsel %vm720_vm12, %v692_v16, %v729_v18  ;;  %v1216_v24 = vpop.f32.mrb[4].mxu1  ;;  %v1133_v18 = vld [vmem:[%s1541_s10] ss:$0 sm:$0xff] }
 0x1f1   : > { %v744_v25 = vpack.c.bf16 %v737_v23, %v736_v21  ;;  %v713_v26 = vadd.f32 %v1216_v24, %v1111_v5  ;;  %v704_v27 = vpop.f32.mrb[5].mxu1 }
 0x1f2   : > { %v705_v28 = vadd.f32 %v1111_v5, %v704_v27  ;;  %v1217_v29 = vpop.f32.mrb[6].mxu1 }
 0x1f3   : > { %v734_v30 = vmul.f32 %v727_v7, %v713_v26  ;;  %v716_v31 = vadd.f32 %v1217_v29, %v1111_v5  ;;  %v707_v32 = vpop.f32.mrb[7].mxu1  ;;  %1230 = vmatprep.mubr.msk.bf16.mxu0 %vm474_vm0, %v744_v25  ;;  %vm725_vm13 = vcmp.ge.f32.partialorder %v713_v26, 0.0 }
 0x1f4   : > { %v732_v33 = vmul.f32 %v727_v7, %v705_v28  ;;  %v708_v34 = vadd.f32 %v1111_v5, %v707_v32  ;;  %1231 = vmatmul.mubr.msk.bf16.vlgmr.msra.gmra.mrb[8].mxu0 %vm474_vm0, %v745_v22  ;;  %vm723_vm14 = vcmp.ge.f32.partialorder %v705_v28, 0.0 }
 0x1f5   : > { %vm726_vm15 = vcmp.ge.f32.partialorder %v716_v31, 0.0  ;;  %v735_v35 = vmul.f32 %v727_v7, %v716_v31  ;;  %v742_v37 = vsel %vm725_vm13, %v713_v26, %v734_v30 }
 0x1f6   : > { %vm724_vm1 = vcmp.ge.f32.partialorder %v708_v34, 0.0  ;;  %v733_v36 = vmul.f32 %v727_v7, %v708_v34  ;;  %v740_v39 = vsel %vm723_vm14, %v705_v28, %v732_v33 }
 0x1f7   : > { %v743_v38 = vsel %vm726_vm15, %v716_v31, %v735_v35 }
 0x1f8   : > { %v747_v40 = vpack.c.bf16 %v743_v38, %v742_v37  ;;  %v741_v41 = vsel %vm724_vm1, %v708_v34, %v733_v36 }
 0x1f9   : > { %v746_v42 = vpack.c.bf16 %v741_v41, %v740_v39 }
 0x1fb   : > { %1234 = vmatprep.mubr.msk.bf16.mxu0 %vm474_vm0, %v746_v42 }
 0x1fc   : > { %1235 = vmatmul.mubr.msk.bf16.gmra.mrb[12].mxu0 %vm474_vm0, %v747_v40 }
 0x2c7   : > { %v1232_v45 = vpop.f32.mrb[8].mxu0 }
 0x2c8   : > { %v858_v47 = vadd.f32 %v1232_v45, %v1122_v44  ;;  %v849_v48 = vpop.f32.mrb[9].mxu0 }
 0x2c9   : > { %v850_v49 = vadd.f32 %v1122_v44, %v849_v48  ;;  %v1233_v50 = vpop.f32.mrb[10].mxu0 }
 0x2ca   : > { %v891_v51 = vmul.f32 %v888_v46, %v858_v47  ;;  %v861_v52 = vadd.f32 %v1233_v50, %v1122_v44  ;;  %v852_v53 = vpop.f32.mrb[11].mxu0  ;;  %vm882_vm0 = vcmp.ge.f32.partialorder %v858_v47, 0.0 }
 0x2cb   : > { %v889_v54 = vmul.f32 %v888_v46, %v850_v49  ;;  %v853_v55 = vadd.f32 %v1122_v44, %v852_v53  ;;  %vm880_vm2 = vcmp.ge.f32.partialorder %v850_v49, 0.0 }
 0x2cc   : > { %vm883_vm3 = vcmp.ge.f32.partialorder %v861_v52, 0.0  ;;  %v892_v56 = vmul.f32 %v888_v46, %v861_v52  ;;  %v899_v58 = vsel %vm882_vm0, %v858_v47, %v891_v51 }
 0x2cd   : > { %vm881_vm4 = vcmp.ge.f32.partialorder %v853_v55, 0.0  ;;  %v890_v57 = vmul.f32 %v888_v46, %v853_v55  ;;  %v897_v60 = vsel %vm880_vm2, %v850_v49, %v889_v54 }
 0x2ce   : > { %v900_v59 = vsel %vm883_vm3, %v861_v52, %v892_v56 }
 0x2cf   : > { %v906_v61 = vpack.c.bf16 %v900_v59, %v899_v58  ;;  %v898_v62 = vsel %vm881_vm4, %v853_v55, %v890_v57  ;;  %v1236_v63 = vpop.f32.mrb[12].mxu0 }
 0x2d0   : > { %v905_v0 = vpack.c.bf16 %v898_v62, %v897_v60  ;;  %v874_v1 = vadd.f32 %v1236_v63, %v1122_v44  ;;  %v865_v2 = vpop.f32.mrb[13].mxu0 }
 0x2d1   : > { %v866_v3 = vadd.f32 %v1122_v44, %v865_v2  ;;  %v1237_v4 = vpop.f32.mrb[14].mxu0 }
 0x2d2   : > { %v895_v5 = vmul.f32 %v888_v46, %v874_v1  ;;  %v877_v6 = vadd.f32 %v1237_v4, %v1122_v44  ;;  %v868_v7 = vpop.f32.mrb[15].mxu0  ;;  %1242 = vmatprep.mubr.msk.bf16.mxu1 %vm932_vm5, %v905_v0  ;;  %vm886_vm6 = vcmp.ge.f32.partialorder %v874_v1, 0.0 }
 0x2d3   : > { %v893_v8 = vmul.f32 %v888_v46, %v866_v3  ;;  %v869_v9 = vadd.f32 %v1122_v44, %v868_v7  ;;  %1243 = vmatmul.mubr.msk.bf16.vlgmr.msra.gmra.mrb[8].mxu1 %vm932_vm5, %v906_v61  ;;  %vm884_vm7 = vcmp.ge.f32.partialorder %v866_v3, 0.0 }
 0x2d4   : > { %vm887_vm8 = vcmp.ge.f32.partialorder %v877_v6, 0.0  ;;  %v896_v10 = vmul.f32 %v888_v46, %v877_v6  ;;  %v903_v12 = vsel %vm886_vm6, %v874_v1, %v895_v5 }
 0x2d5   : > { %vm885_vm9 = vcmp.ge.f32.partialorder %v869_v9, 0.0  ;;  %v894_v11 = vmul.f32 %v888_v46, %v869_v9  ;;  %v901_v14 = vsel %vm884_vm7, %v866_v3, %v893_v8 }
 0x2d6   : > { %v904_v13 = vsel %vm887_vm8, %v877_v6, %v896_v10 }
 0x2d7   : > { %v908_v15 = vpack.c.bf16 %v904_v13, %v903_v12  ;;  %v902_v16 = vsel %vm885_vm9, %v869_v9, %v894_v11 }
 0x2d8   : > { %v907_v17 = vpack.c.bf16 %v902_v16, %v901_v14 }
 0x2da   : > { %1246 = vmatprep.mubr.msk.bf16.mxu1 %vm932_vm5, %v907_v17 }
 0x2db   : > { %1247 = vmatmul.mubr.msk.bf16.gmra.mrb[12].mxu1 %vm932_vm5, %v908_v15 }
 0x3a6   : > { %v1244_v19 = vpop.f32.mrb[8].mxu1 }
 0x3a7   : > { %v988_v20 = vadd.f32 %v1244_v19, %v1133_v18  ;;  %v979_v21 = vpop.f32.mrb[9].mxu1 }
 0x3a8   : > { %v980_v22 = vadd.f32 %v1133_v18, %v979_v21  ;;  %v1245_v23 = vpop.f32.mrb[10].mxu1 }
 0x3a9   : > { %1013 = vst.msk [vmem:[%s402_s20 + $0x10] sm:$0xff] %vm1010_vm10, %v988_v20  ;;  %v991_v24 = vadd.f32 %v1245_v23, %v1133_v18  ;;  %v982_v25 = vpop.f32.mrb[11].mxu1 }
 0x3aa   : > { %1011 = vst.msk [vmem:[%s402_s20] sm:$0xff] %vm1010_vm10, %v980_v22  ;;  %v983_v26 = vadd.f32 %v1133_v18, %v982_v25 }
 0x3ab   : > { %1014 = vst.msk [vmem:[%s402_s20 + $0x18] sm:$0xff] %vm1010_vm10, %v991_v24 }
 0x3ac   : > { %1012 = vst.msk [vmem:[%s402_s20 + $0x8] sm:$0xff] %vm1010_vm10, %v983_v26 }
 0x3ae   : > { %v1248_v27 = vpop.f32.mrb[12].mxu1 }
 0x3af   : > { %v1004_v28 = vadd.f32 %v1248_v27, %v1133_v18  ;;  %v995_v29 = vpop.f32.mrb[13].mxu1 }
 0x3b0   : > { %v996_v30 = vadd.f32 %v1133_v18, %v995_v29  ;;  %v1249_v31 = vpop.f32.mrb[14].mxu1 }
 0x3b1   : > { %1017 = vst.msk [vmem:[%s402_s20 + $0x30] sm:$0xff] %vm1010_vm10, %v1004_v28  ;;  %v1007_v32 = vadd.f32 %v1249_v31, %v1133_v18  ;;  %v998_v33 = vpop.f32.mrb[15].mxu1 }
 0x3b2   : > { %1015 = vst.msk [vmem:[%s402_s20 + $0x20] sm:$0xff] %vm1010_vm10, %v996_v30  ;;  %v999_v34 = vadd.f32 %v1133_v18, %v998_v33 }
 0x3b3   : > { %1018 = vst.msk [vmem:[%s402_s20 + $0x38] sm:$0xff] %vm1010_vm10, %v1007_v32 }
 0x3b4   : > { %1016 = vst.msk [vmem:[%s402_s20 + $0x28] sm:$0xff] %vm1010_vm10, %v999_v34 }
 0x3b5 PF: > { %s22_s17 = sadd.s32 1, %s1314_s17  }
 0x3b6   : > { %p19_p1 = scmp.ge.s32.totalorder %s22_s17, 4  }
 0x3b8   :  { %21 = sbr.rel (!%p19_p1) target bundleno = 1 (0x1), region = 99 }
 0x3bf   :  { %1041 = vsyncpa [#allocation3], 1 }
 0x3c0   :  { %1043 = vsyncpa [#allocation3 + $0x1], 1 }

// kernel: tpu_custom_call.1
= control target key start
LH: loop header
LB: loop body
LE: loop exit
PB: predicated region body
PF: predicated region fallthrough
CT: control target
= control target key end

     0   :  { %16 = vsyncpa [#allocation3], 0  ;;  %s1377_s17 = smov 0   ;;  %s1531_s0 = inlined_call_operand.vmem [shape: f32[2], index: 0, kind: input, shape index: {}]   ;;  %s1532_s1 = inlined_call_operand.vmem [shape: f32[128,96], index: 1, kind: input, shape index: {}]   ;;  %s1533_s2 = inlined_call_operand.vmem [shape: bf16[96,96], index: 2, kind: input, shape index: {}]   ;;  %s1534_s3 = inlined_call_operand.vmem [shape: bf16[96,96], index: 3, kind: input, shape index: {}]   ;;  %s1535_s4 = inlined_call_operand.vmem [shape: f32[1,96], index: 4, kind: input, shape index: {}]   ;;  %s1536_s5 = inlined_call_operand.vmem [shape: f32[1,96], index: 5, kind: input, shape index: {}]   ;;  %s1537_s6 = inlined_call_operand.vmem [shape: f32[1,96], index: 6, kind: input, shape index: {}]   ;;  %s1538_s7 = inlined_call_operand.vmem [shape: bf16[96,32], index: 7, kind: input, shape index: {}]   ;;  %s1539_s8 = inlined_call_operand.vmem [shape: bf16[32,16], index: 8, kind: input, shape index: {}]   ;;  %s1540_s9 = inlined_call_operand.vmem [shape: f32[1,32], index: 9, kind: input, shape index: {}]   ;;  %s1541_s10 = inlined_call_operand.vmem [shape: f32[1,16], index: 10, kind: input, shape index: {}]   ;;  %s1542_s11 = inlined_call_operand.vmem [shape: f32[128,16], index: 11, kind: output, shape index: {}]  }
   0x1 LB: > { %s1087_s18 = sadd.s32 4294967295, %s1314_s17   ;;  %p1089_p0 = scmp.ge.s32.totalorder %s1314_s17, 1  ;;  %s1314_s17 = sphi %s1377_s17, %s22_s17  }
   0x2   : > { %p289_p1 = scmp.lt.s32.totalorder %s1314_s17, 3  ;;  %s302_s21 = sshll.u32 %s1531_s0, 4  ;;  %s303_s21 = int_to_ptr.vmem [resolvable:$true] %s302_s21 }
   0x3   : > { %p1392_p3 = scmp.eq.s32.totalorder %s1087_s18, 0  ;;  %s1289_s24 = scalar_lea.vmem %s303_s21, 16 }
   0x4   : > { %p1388_p2 = pnand %p1089_p0, %p289_p1  ;;  %p1290_p6 = scmp.ne.s32.totalorder %s303_s21, %s1289_s24 }
   0x5   : > { %p1297_p10 = scmp.lt.s32.totalorder %s303_s21, %s303_s21  ;;  %p1298_p11 = scmp.lt.s32.totalorder %s1289_s24, %s1289_s24 }
   0x6   : > { %p1254_p4 = pneg %p1388_p2 }
   0x7   : > { %p1299_p12 = por %p1298_p11, %p1297_p10 }
   0x8   : > { %p1255_p5 = pnand %p1392_p3, %p1254_p4 }
   0xa   : > { %p1291_p7 = pneg %p1255_p5 }
   0xc   : > { %p1292_p8 = pnand %p1291_p7, %p1290_p6 }
   0xe   : > { %p1293_p9 = pneg %p1292_p8 }
  0x10   : > { %p1300_p13 = pnand %p1299_p12, %p1293_p9 }
  0x12   : > { %1303 = shalt.err (!%p1300_p13)
}
  0x13   : > { %s1316_s25 = smov [#allocation2]   ;;  %351 = sbr.rel (%p1388_p2) target bundleno = 949 (0x3b5), region = 64 }
  0x14   : > { %1257 = dma.vmem_to_smem (!%p1255_p5), %s303_s21, 16, %s1316_s25, [#allocation3]  }
  0x1a   : > { %1309 = dma.done.wait (%p1392_p3), [#allocation3], 16  }
  0x1b   : > { %1311 = vsyncadd (%p1392_p3), [#allocation3], 4294967280 }
  0x1c   : > { %357 = sfence }
  0x1d   : > { %v1269_v0 = vld [vmem:[%s1533_s2] sm:$0xff]   ;;  %s1094_s28 = sshll.u32 %s1087_s18, 3  ;;  %v1270_v1 = vld [vmem:[%s1533_s2 + $0x8] sm:$0xff]   ;;  %v1271_v2 = vld [vmem:[%s1533_s2 + $0x10] sm:$0xff]   ;;  %vm474_vm0 = vcmask 785408   ;;  %s405_s23 = sld [smem:[#allocation2]] }
  0x1e   : > { %p393_p0 = scmp.lt.s32.totalorder %s1094_s28, 15  ;;  %1178 = vmatprep.subr.bf16.mxu0 %v1269_v0  ;;  %v1275_v3 = vld [vmem:[%s1534_s3] sm:$0xff]   ;;  %v1272_v6 = vld [vmem:[%s1533_s2 + $0x18] sm:$0xff]   ;;  %v1276_v9 = vld [vmem:[%s1534_s3 + $0x8] sm:$0xff]   ;;  %s1098_s29 = sld [smem:[#allocation2 + $0x1]] }
  0x1f   : > { %1179 = vmatpush3.bf16.msra.mxu0 %v1269_v0  ;;  %1198 = vmatprep.subr.bf16.mxu1 %v1275_v3  ;;  %v1273_v8 = vld [vmem:[%s1533_s2 + $0x20] sm:$0xff]   ;;  %v1277_v10 = vld [vmem:[%s1534_s3 + $0x10] sm:$0xff]   ;;  %v1274_v11 = vld [vmem:[%s1533_s2 + $0x28] sm:$0xff]  }
  0x20   : > { %s1546_s28 = smov (!%p393_p0, %s1094_s28), 15  ;;  %1180 = vmatprep.subr.bf16.mxu0 %v1270_v1  ;;  %1199 = vmatpush3.bf16.msra.mxu1 %v1275_v3  ;;  %v1278_v21 = vld [vmem:[%s1534_s3 + $0x18] sm:$0xff]   ;;  %v1279_v22 = vld [vmem:[%s1534_s3 + $0x20] sm:$0xff]   ;;  %v1280_v23 = vld [vmem:[%s1534_s3 + $0x28] sm:$0xff]  }
  0x21   : > { %s1095_s14 = sshll.u32 %s1546_s28, 3  ;;  %1200 = vmatprep.subr.bf16.mxu1 %v1276_v9  ;;  %v1281_v24 = vld [vmem:[%s1538_s7] sm:$0xff]   ;;  %v1282_v25 = vld [vmem:[%s1538_s7 + $0x8] sm:$0xff]   ;;  %v1283_v26 = vld [vmem:[%s1538_s7 + $0x10] sm:$0xff]  }
  0x22   : > { %s1423_s18 = scalar_lea.vmem %s1532_s1, %s1095_s14  ;;  %v1099_v27 = vld [vmem:[%s1535_s4] ss:$0 sm:$0xff]  ;;  %v1286_v3 = vld [vmem:[%s1538_s7 + $0x28] sm:$0xff]   ;;  %s402_s20 = scalar_lea.vmem %s1542_s11, %s1095_s14 }
  0x23   : > { %1181 = vmatpush3.bf16.msra.mxu0 %v1270_v1  ;;  %v407_v4 = vld [vmem:[%s1423_s18] sm:$0xff]  ;;  %v408_v5 = vld [vmem:[%s1423_s18 + $0x8] sm:$0xff]  ;;  %v409_v12 = vld [vmem:[%s1423_s18 + $0x10] sm:$0xff] }
  0x24   : > { %1182 = vmatprep.subr.bf16.mxu0 %v1271_v2  ;;  %v415_v7 = vpack.c.bf16 %v408_v5, %v407_v4  ;;  %1201 = vmatpush3.bf16.msra.mxu1 %v1276_v9  ;;  %v410_v13 = vld [vmem:[%s1423_s18 + $0x18] sm:$0xff]  ;;  %v411_v14 = vld [vmem:[%s1423_s18 + $0x20] sm:$0xff]  ;;  %v412_v15 = vld [vmem:[%s1423_s18 + $0x28] sm:$0xff] }
  0x25   : > { %1202 = vmatprep.subr.bf16.mxu1 %v1277_v10  ;;  %v416_v16 = vpack.c.bf16 %v410_v13, %v409_v12  ;;  %v417_v17 = vpack.c.bf16 %v412_v15, %v411_v14  ;;  %v413_v18 = vld [vmem:[%s1423_s18 + $0x30] sm:$0xff]  ;;  %v414_v19 = vld [vmem:[%s1423_s18 + $0x38] sm:$0xff]  ;;  %v1110_v29 = vld [vmem:[%s1537_s6] ss:$0 sm:$0xff] }
  0x26   : > { %1190 = vmatprep.mubr.msk.bf16.mxu0 %vm474_vm0, %v415_v7  ;;  %v418_v20 = vpack.c.bf16 %v414_v19, %v413_v18  ;;  %v1284_v1 = vld [vmem:[%s1538_s7 + $0x18] sm:$0xff]   ;;  %v1287_v4 = vld [vmem:[%s1539_s8] sm:$0xff]   ;;  %v727_v7 = vstv %s405_s23 }
  0x27   : > { %1183 = vmatpush3.bf16.msra.mxu0 %v1271_v2  ;;  %v1285_v2 = vld [vmem:[%s1538_s7 + $0x20] sm:$0xff]  }
  0x28   : > { %1184 = vmatprep.subr.bf16.mxu0 %v1272_v6  ;;  %1203 = vmatpush3.bf16.msra.mxu1 %v1277_v10  ;;  %v1111_v5 = vld [vmem:[%s1536_s5] ss:$0 sm:$0xff] }
  0x29   : > { %1204 = vmatprep.subr.bf16.mxu1 %v1278_v21 }
  0x2b   : > { %1185 = vmatpush3.bf16.msra.mxu0 %v1272_v6 }
  0x2c   : > { %1186 = vmatprep.subr.bf16.mxu0 %v1273_v8  ;;  %1205 = vmatpush3.bf16.msra.mxu1 %v1278_v21 }
  0x2d   : > { %1206 = vmatprep.subr.bf16.mxu1 %v1279_v22 }
  0x2f   : > { %1187 = vmatpush3.bf16.msra.mxu0 %v1273_v8 }
  0x30   : > { %1188 = vmatprep.subr.bf16.mxu0 %v1274_v11  ;;  %1207 = vmatpush3.bf16.msra.mxu1 %v1279_v22 }
  0x31   : > { %1208 = vmatprep.subr.bf16.mxu1 %v1280_v23 }
  0x33   : > { %1189 = vmatpush3.bf16.msra.mxu0 %v1274_v11 }
  0x34   : > { %1209 = vmatpush3.bf16.msra.mxu1 %v1280_v23  ;;  %1218 = vmatprep.subr.bf16.mxu0 %v1281_v24 }
  0x35   : > { %1238 = vmatprep.subr.bf16.mxu1 %v1287_v4 }
  0x36   : > { %1191 = vmatmul.mubr.msk.bf16.vlgmr.msra.gmra.mrb[0].mxu0 %vm474_vm0, %v416_v16 }
  0x37   : > { %1194 = vmatprep.mubr.msk.bf16.mxu0 %vm474_vm0, %v417_v17  ;;  %1219 = vmatpush3.bf16.msra.mxu0 %v1281_v24 }
  0x38   : > { %1220 = vmatprep.subr.bf16.mxu0 %v1282_v25 }
  0x3b   : > { %1221 = vmatpush3.bf16.msra.mxu0 %v1282_v25 }
  0x3c   : > { %1222 = vmatprep.subr.bf16.mxu0 %v1283_v26 }
  0x3e   : > { %1195 = vmatmul.mubr.msk.bf16.gmra.mrb[4].mxu0 %vm474_vm0, %v418_v20 }
  0x3f   : > { %1223 = vmatpush3.bf16.msra.mxu0 %v1283_v26 }
  0x40   : > { %1224 = vmatprep.subr.bf16.mxu0 %v1284_v1 }
  0x43   : > { %1225 = vmatpush3.bf16.msra.mxu0 %v1284_v1 }
  0x44   : > { %1226 = vmatprep.subr.bf16.mxu0 %v1285_v2 }
  0x47   : > { %1227 = vmatpush3.bf16.msra.mxu0 %v1285_v2 }
  0x48   : > { %1228 = vmatprep.subr.bf16.mxu0 %v1286_v3 }
  0x4b   : > { %1229 = vmatpush3.bf16.msra.mxu0 %v1286_v3 }
 0x109   : > { %v1192_v28 = vpop.f32.mrb[0].mxu0 }
 0x10a   : > { %v530_v30 = vadd.f32 %v1192_v28, %v1099_v27  ;;  %v521_v31 = vpop.f32.mrb[1].mxu0 }
 0x10b   : > { %v522_v32 = vadd.f32 %v1099_v27, %v521_v31  ;;  %v1193_v33 = vpop.f32.mrb[2].mxu0 }
 0x10c   : > { %v569_v34 = vmul.f32 %v1110_v29, %v530_v30  ;;  %v533_v35 = vadd.f32 %v1193_v33, %v1099_v27  ;;  %v524_v36 = vpop.f32.mrb[3].mxu0  ;;  %vm555_vm1 = vcmp.ge.f32.partialorder %v530_v30, 0.0 }
 0x10d   : > { %v567_v37 = vmul.f32 %v1110_v29, %v522_v32  ;;  %v525_v38 = vadd.f32 %v1099_v27, %v524_v36  ;;  %vm553_vm3 = vcmp.ge.f32.partialorder %v522_v32, 0.0 }
 0x10e   : > { %vm556_vm2 = vcmp.ge.f32.partialorder %v533_v35, 0.0  ;;  %v570_v39 = vmul.f32 %v1110_v29, %v533_v35  ;;  %v577_v41 = vsel %vm555_vm1, %v530_v30, %v569_v34 }
 0x10f   : > { %v568_v40 = vmul.f32 %v1110_v29, %v525_v38  ;;  %vm554_vm4 = vcmp.ge.f32.partialorder %v525_v38, 0.0  ;;  %v575_v45 = vsel %vm553_vm3, %v522_v32, %v567_v37 }
 0x110   : > { %v578_v42 = vsel %vm556_vm2, %v533_v35, %v570_v39 }
 0x111   : > { %v584_v43 = vpack.c.bf16 %v578_v42, %v577_v41  ;;  %v1196_v44 = vpop.f32.mrb[4].mxu0  ;;  %v576_v46 = vsel %vm554_vm4, %v525_v38, %v568_v40 }
 0x112   : > { %v546_v47 = vadd.f32 %v1196_v44, %v1099_v27  ;;  %v537_v48 = vpop.f32.mrb[5].mxu0  ;;  %v583_v49 = vpack.c.bf16 %v576_v46, %v575_v45  ;;  %v1122_v44 = vld [vmem:[%s1540_s9] ss:$0 sm:$0xff]  ;;  %v888_v46 = vstv %s1098_s29 }
 0x113   : > { %v538_v50 = vadd.f32 %v1099_v27, %v537_v48  ;;  %v1197_v51 = vpop.f32.mrb[6].mxu0 }
 0x114   : > { %v573_v52 = vmul.f32 %v1110_v29, %v546_v47  ;;  %v549_v53 = vadd.f32 %v1197_v51, %v1099_v27  ;;  %v540_v54 = vpop.f32.mrb[7].mxu0  ;;  %1210 = vmatprep.mubr.msk.bf16.mxu1 %vm474_vm0, %v583_v49  ;;  %vm559_vm5 = vcmp.ge.f32.partialorder %v546_v47, 0.0 }
 0x115   : > { %v571_v55 = vmul.f32 %v1110_v29, %v538_v50  ;;  %v541_v56 = vadd.f32 %v1099_v27, %v540_v54  ;;  %1211 = vmatmul.mubr.msk.bf16.vlgmr.msra.gmra.mrb[0].mxu1 %vm474_vm0, %v584_v43  ;;  %vm557_vm6 = vcmp.ge.f32.partialorder %v538_v50, 0.0  ;;  %v1288_v43 = vld [vmem:[%s1539_s8 + $0x8] sm:$0xff]  }
 0x116   : > { %vm560_vm7 = vcmp.ge.f32.partialorder %v549_v53, 0.0  ;;  %v574_v57 = vmul.f32 %v1110_v29, %v549_v53  ;;  %v581_v59 = vsel %vm559_vm5, %v546_v47, %v573_v52  ;;  %1239 = vmatpush3.bf16.msra.mxu1 %v1287_v4  ;;  %vm932_vm5 = vcmask 261120  }
 0x117   : > { %vm558_vm8 = vcmp.ge.f32.partialorder %v541_v56, 0.0  ;;  %v572_v58 = vmul.f32 %v1110_v29, %v541_v56  ;;  %v579_v61 = vsel %vm557_vm6, %v538_v50, %v571_v55  ;;  %1240 = vmatprep.subr.bf16.mxu1 %v1288_v43 }
 0x118   : > { %v582_v60 = vsel %vm560_vm7, %v549_v53, %v574_v57 }
 0x119   : > { %v586_v62 = vpack.c.bf16 %v582_v60, %v581_v59  ;;  %v580_v63 = vsel %vm558_vm8, %v541_v56, %v572_v58 }
 0x11a   : > { %v585_v0 = vpack.c.bf16 %v580_v63, %v579_v61  ;;  %1241 = vmatpush3.bf16.msra.mxu1 %v1288_v43 }
 0x11c   : > { %1214 = vmatprep.mubr.msk.bf16.mxu1 %vm474_vm0, %v585_v0 }
 0x11d   : > { %1215 = vmatmul.mubr.msk.bf16.gmra.mrb[4].mxu1 %vm474_vm0, %v586_v62 }
 0x1e8   : > { %v1212_v6 = vpop.f32.mrb[0].mxu1 }
 0x1e9   : > { %v697_v8 = vadd.f32 %v1212_v6, %v1111_v5  ;;  %v688_v9 = vpop.f32.mrb[1].mxu1 }
 0x1ea   : > { %v689_v10 = vadd.f32 %v1111_v5, %v688_v9  ;;  %v1213_v11 = vpop.f32.mrb[2].mxu1 }
 0x1eb   : > { %v730_v12 = vmul.f32 %v727_v7, %v697_v8  ;;  %v700_v13 = vadd.f32 %v1213_v11, %v1111_v5  ;;  %v691_v14 = vpop.f32.mrb[3].mxu1  ;;  %vm721_vm9 = vcmp.ge.f32.partialorder %v697_v8, 0.0 }
 0x1ec   : > { %v728_v15 = vmul.f32 %v727_v7, %v689_v10  ;;  %v692_v16 = vadd.f32 %v1111_v5, %v691_v14  ;;  %vm719_vm10 = vcmp.ge.f32.partialorder %v689_v10, 0.0 }
 0x1ed   : > { %vm722_vm11 = vcmp.ge.f32.partialorder %v700_v13, 0.0  ;;  %v731_v17 = vmul.f32 %v727_v7, %v700_v13  ;;  %v738_v19 = vsel %vm721_vm9, %v697_v8, %v730_v12 }
 0x1ee   : > { %vm720_vm12 = vcmp.ge.f32.partialorder %v692_v16, 0.0  ;;  %v729_v18 = vmul.f32 %v727_v7, %v692_v16  ;;  %v736_v21 = vsel %vm719_vm10, %v689_v10, %v728_v15  ;;  %vm1010_vm10 = vcmask 130048  }
 0x1ef   : > { %v739_v20 = vsel %vm722_vm11, %v700_v13, %v731_v17 }
 0x1f0   : > { %v745_v22 = vpack.c.bf16 %v739_v20, %v738_v19  ;;  %v737_v23 = vsel %vm720_vm12, %v692_v16, %v729_v18  ;;  %v1216_v24 = vpop.f32.mrb[4].mxu1  ;;  %v1133_v18 = vld [vmem:[%s1541_s10] ss:$0 sm:$0xff] }
 0x1f1   : > { %v744_v25 = vpack.c.bf16 %v737_v23, %v736_v21  ;;  %v713_v26 = vadd.f32 %v1216_v24, %v1111_v5  ;;  %v704_v27 = vpop.f32.mrb[5].mxu1 }
 0x1f2   : > { %v705_v28 = vadd.f32 %v1111_v5, %v704_v27  ;;  %v1217_v29 = vpop.f32.mrb[6].mxu1 }
 0x1f3   : > { %v734_v30 = vmul.f32 %v727_v7, %v713_v26  ;;  %v716_v31 = vadd.f32 %v1217_v29, %v1111_v5  ;;  %v707_v32 = vpop.f32.mrb[7].mxu1  ;;  %1230 = vmatprep.mubr.msk.bf16.mxu0 %vm474_vm0, %v744_v25  ;;  %vm725_vm13 = vcmp.ge.f32.partialorder %v713_v26, 0.0 }
 0x1f4   : > { %v732_v33 = vmul.f32 %v727_v7, %v705_v28  ;;  %v708_v34 = vadd.f32 %v1111_v5, %v707_v32  ;;  %1231 = vmatmul.mubr.msk.bf16.vlgmr.msra.gmra.mrb[8].mxu0 %vm474_vm0, %v745_v22  ;;  %vm723_vm14 = vcmp.ge.f32.partialorder %v705_v28, 0.0 }
 0x1f5   : > { %vm726_vm15 = vcmp.ge.f32.partialorder %v716_v31, 0.0  ;;  %v735_v35 = vmul.f32 %v727_v7, %v716_v31  ;;  %v742_v37 = vsel %vm725_vm13, %v713_v26, %v734_v30 }
 0x1f6   : > { %vm724_vm1 = vcmp.ge.f32.partialorder %v708_v34, 0.0  ;;  %v733_v36 = vmul.f32 %v727_v7, %v708_v34  ;;  %v740_v39 = vsel %vm723_vm14, %v705_v28, %v732_v33 }
 0x1f7   : > { %v743_v38 = vsel %vm726_vm15, %v716_v31, %v735_v35 }
 0x1f8   : > { %v747_v40 = vpack.c.bf16 %v743_v38, %v742_v37  ;;  %v741_v41 = vsel %vm724_vm1, %v708_v34, %v733_v36 }
 0x1f9   : > { %v746_v42 = vpack.c.bf16 %v741_v41, %v740_v39 }
 0x1fb   : > { %1234 = vmatprep.mubr.msk.bf16.mxu0 %vm474_vm0, %v746_v42 }
 0x1fc   : > { %1235 = vmatmul.mubr.msk.bf16.gmra.mrb[12].mxu0 %vm474_vm0, %v747_v40 }
 0x2c7   : > { %v1232_v45 = vpop.f32.mrb[8].mxu0 }
 0x2c8   : > { %v858_v47 = vadd.f32 %v1232_v45, %v1122_v44  ;;  %v849_v48 = vpop.f32.mrb[9].mxu0 }
 0x2c9   : > { %v850_v49 = vadd.f32 %v1122_v44, %v849_v48  ;;  %v1233_v50 = vpop.f32.mrb[10].mxu0 }
 0x2ca   : > { %v891_v51 = vmul.f32 %v888_v46, %v858_v47  ;;  %v861_v52 = vadd.f32 %v1233_v50, %v1122_v44  ;;  %v852_v53 = vpop.f32.mrb[11].mxu0  ;;  %vm882_vm0 = vcmp.ge.f32.partialorder %v858_v47, 0.0 }
 0x2cb   : > { %v889_v54 = vmul.f32 %v888_v46, %v850_v49  ;;  %v853_v55 = vadd.f32 %v1122_v44, %v852_v53  ;;  %vm880_vm2 = vcmp.ge.f32.partialorder %v850_v49, 0.0 }
 0x2cc   : > { %vm883_vm3 = vcmp.ge.f32.partialorder %v861_v52, 0.0  ;;  %v892_v56 = vmul.f32 %v888_v46, %v861_v52  ;;  %v899_v58 = vsel %vm882_vm0, %v858_v47, %v891_v51 }
 0x2cd   : > { %vm881_vm4 = vcmp.ge.f32.partialorder %v853_v55, 0.0  ;;  %v890_v57 = vmul.f32 %v888_v46, %v853_v55  ;;  %v897_v60 = vsel %vm880_vm2, %v850_v49, %v889_v54 }
 0x2ce   : > { %v900_v59 = vsel %vm883_vm3, %v861_v52, %v892_v56 }
 0x2cf   : > { %v906_v61 = vpack.c.bf16 %v900_v59, %v899_v58  ;;  %v898_v62 = vsel %vm881_vm4, %v853_v55, %v890_v57  ;;  %v1236_v63 = vpop.f32.mrb[12].mxu0 }
 0x2d0   : > { %v905_v0 = vpack.c.bf16 %v898_v62, %v897_v60  ;;  %v874_v1 = vadd.f32 %v1236_v63, %v1122_v44  ;;  %v865_v2 = vpop.f32.mrb[13].mxu0 }
 0x2d1   : > { %v866_v3 = vadd.f32 %v1122_v44, %v865_v2  ;;  %v1237_v4 = vpop.f32.mrb[14].mxu0 }
 0x2d2   : > { %v895_v5 = vmul.f32 %v888_v46, %v874_v1  ;;  %v877_v6 = vadd.f32 %v1237_v4, %v1122_v44  ;;  %v868_v7 = vpop.f32.mrb[15].mxu0  ;;  %1242 = vmatprep.mubr.msk.bf16.mxu1 %vm932_vm5, %v905_v0  ;;  %vm886_vm6 = vcmp.ge.f32.partialorder %v874_v1, 0.0 }
 0x2d3   : > { %v893_v8 = vmul.f32 %v888_v46, %v866_v3  ;;  %v869_v9 = vadd.f32 %v1122_v44, %v868_v7  ;;  %1243 = vmatmul.mubr.msk.bf16.vlgmr.msra.gmra.mrb[8].mxu1 %vm932_vm5, %v906_v61  ;;  %vm884_vm7 = vcmp.ge.f32.partialorder %v866_v3, 0.0 }
 0x2d4   : > { %vm887_vm8 = vcmp.ge.f32.partialorder %v877_v6, 0.0  ;;  %v896_v10 = vmul.f32 %v888_v46, %v877_v6  ;;  %v903_v12 = vsel %vm886_vm6, %v874_v1, %v895_v5 }
 0x2d5   : > { %vm885_vm9 = vcmp.ge.f32.partialorder %v869_v9, 0.0  ;;  %v894_v11 = vmul.f32 %v888_v46, %v869_v9  ;;  %v901_v14 = vsel %vm884_vm7, %v866_v3, %v893_v8 }
 0x2d6   : > { %v904_v13 = vsel %vm887_vm8, %v877_v6, %v896_v10 }
 0x2d7   : > { %v908_v15 = vpack.c.bf16 %v904_v13, %v903_v12  ;;  %v902_v16 = vsel %vm885_vm9, %v869_v9, %v894_v11 }
 0x2d8   : > { %v907_v17 = vpack.c.bf16 %v902_v16, %v901_v14 }
 0x2da   : > { %1246 = vmatprep.mubr.msk.bf16.mxu1 %vm932_vm5, %v907_v17 }
 0x2db   : > { %1247 = vmatmul.mubr.msk.bf16.gmra.mrb[12].mxu1 %vm932_vm5, %v908_v15 }
 0x3a6   : > { %v1244_v19 = vpop.f32.mrb[8].mxu1 }
 0x3a7   : > { %v988_v20 = vadd.f32 %v1244_v19, %v1133_v18  ;;  %v979_v21 = vpop.f32.mrb[9].mxu1 }
 0x3a8   : > { %v980_v22 = vadd.f32 %v1133_v18, %v979_v21  ;;  %v1245_v23 = vpop.f32.mrb[10].mxu1 }
 0x3a9   : > { %1013 = vst.msk [vmem:[%s402_s20 + $0x10] sm:$0xff] %vm1010_vm10, %v988_v20  ;;  %v991_v24 = vadd.f32 %v1245_v23, %v1133_v18  ;;  %v982_v25 = vpop.f32.mrb[11].mxu1 }
 0x3aa   : > { %1011 = vst.msk [vmem:[%s402_s20] sm:$0xff] %vm1010_vm10, %v980_v22  ;;  %v983_v26 = vadd.f32 %v1133_v18, %v982_v25 }
 0x3ab   : > { %1014 = vst.msk [vmem:[%s402_s20 + $0x18] sm:$0xff] %vm1010_vm10, %v991_v24 }
 0x3ac   : > { %1012 = vst.msk [vmem:[%s402_s20 + $0x8] sm:$0xff] %vm1010_vm10, %v983_v26 }
 0x3ae   : > { %v1248_v27 = vpop.f32.mrb[12].mxu1 }
 0x3af   : > { %v1004_v28 = vadd.f32 %v1248_v27, %v1133_v18  ;;  %v995_v29 = vpop.f32.mrb[13].mxu1 }
 0x3b0   : > { %v996_v30 = vadd.f32 %v1133_v18, %v995_v29  ;;  %v1249_v31 = vpop.f32.mrb[14].mxu1 }
 0x3b1   : > { %1017 = vst.msk [vmem:[%s402_s20 + $0x30] sm:$0xff] %vm1010_vm10, %v1004_v28  ;;  %v1007_v32 = vadd.f32 %v1249_v31, %v1133_v18  ;;  %v998_v33 = vpop.f32.mrb[15].mxu1 }
 0x3b2   : > { %1015 = vst.msk [vmem:[%s402_s20 + $0x20] sm:$0xff] %vm1010_vm10, %v996_v30  ;;  %v999_v34 = vadd.f32 %v1133_v18, %v998_v33 }
 0x3b3   : > { %1018 = vst.msk [vmem:[%s402_s20 + $0x38] sm:$0xff] %vm1010_vm10, %v1007_v32 }
 0x3b4   : > { %1016 = vst.msk [vmem:[%s402_s20 + $0x28] sm:$0xff] %vm1010_vm10, %v999_v34 }
 0x3b5 PF: > { %s22_s17 = sadd.s32 1, %s1314_s17  }
 0x3b6   : > { %p19_p1 = scmp.ge.s32.totalorder %s22_s17, 4  }
 0x3b8   :  { %21 = sbr.rel (!%p19_p1) target bundleno = 1 (0x1), region = 99 }
 0x3bf   :  { %1041 = vsyncpa [#allocation3], 1 }
 0x3c0   :  { %1043 = vsyncpa [#allocation3 + $0x1], 1 }

</bundles_post_ra>
